<compile_context>
chip_gen: v7x
topology: tpu7x:2x2x1
jax: 0.10.0
libtpu: 0.0.40
codegen_flags: <defaults>
</compile_context>

<pallas_src>
import jax
import jax.numpy as jnp
from jax.experimental import pallas as pl
from jax.experimental.pallas import tpu as pltpu

_LANE = 128


def mlp_kernel(x_ref, w1_ref, b1_ref, w2_ref, b2_ref, w3_ref, b3_ref, o_ref):
    xt = x_ref[...]          # (in_dim, tb): features on sublanes, batch on lanes
    w1 = w1_ref[...]         # (h1, in_dim)

    # Layer 1: K = in_dim (=2) is far too small for the MXU; do it on the VPU as a short
    # unrolled chain of MACs. Each input-feature row xt[k:k+1, :] broadcasts along
    # sublanes (cheap); only the tiny constant (h1, 1) weight column lane-splats per k.
    h = w1[:, 0:1] * xt[0:1, :]
    for k in range(1, w1_ref.shape[1]):
        h = h + w1[:, k:k + 1] * xt[k:k + 1, :]
    h = jnp.maximum(h + b1_ref[...], 0.0)                     # (h1, tb)

    # Layer 2: W2 @ h + b2 on the MXU; N = tb >= 128 keeps the operand lane-dense.
    h = jnp.dot(w2_ref[...], h, preferred_element_type=jnp.float32) + b2_ref[...]
    h = jnp.maximum(h, 0.0)                                   # (h2, tb)

    # Layer 3: Linear only (net.pop() removed the trailing ReLU). Output is (out_dim, tb):
    # lane-dense and unpadded, so the store is a full-width vst with no dead lanes.
    o_ref[...] = (
        jnp.dot(w3_ref[...], h, preferred_element_type=jnp.float32) + b3_ref[...]
    ).astype(o_ref.dtype)


def simple_mlp_forward(x, params, *, tile_b=4096):
    """x: [B, input_size] float32.
    params: native PyTorch layout — W{i}: [out_features, in_features], b{i}: [out_features, 1]."""
    B, in_dim = x.shape
    w1, b1 = params["w1"], params["b1"]
    w2, b2 = params["w2"], params["b2"]
    w3, b3 = params["w3"], params["b3"]
    h1 = w1.shape[0]
    h2 = w2.shape[0]
    out_dim = w3.shape[0]

    # Batch lives on the lane axis, so the batch tile must be a multiple of 128.
    # Large default tile (4096) amortizes the ~0.35us/grid-step overhead; VMEM is not
    # remotely a constraint with these tiny feature dims (per-step footprint << 1 MiB).
    # No small-batch 2-way split: on single-TC v5e/v6e it only adds per-step overhead.
    # TODO(synk): for very large B on v7x, a CORE_PARALLEL batch axis would shard across
    # both TensorCores; kept plain "parallel" here for portability.
    tb = min(tile_b, pl.cdiv(B, _LANE) * _LANE)
    tb = max(_LANE, (tb // _LANE) * _LANE)

    xt = x.T                                   # (in_dim, B) — feature-major
    pad_b = (-B) % tb
    if pad_b:
        xt = jnp.pad(xt, ((0, 0), (0, pad_b)))
    Bp = xt.shape[1]
    grid = (Bp // tb,)

    # Full-extent weight/bias blocks (exempt from the (8,128) divisibility constraint),
    # kept resident across grid steps via constant index_maps.
    const_spec = lambda shape: pl.BlockSpec(shape, lambda i: (0, 0))

    flops = 2 * Bp * (in_dim * h1 + h1 * h2 + h2 * out_dim)
    weight_bytes = 4 * (in_dim * h1 + h1 + h1 * h2 + h2 + h2 * out_dim + out_dim)
    bytes_accessed = 4 * Bp * (in_dim + out_dim) + weight_bytes

    out = pl.pallas_call(
        mlp_kernel,
        out_shape=jax.ShapeDtypeStruct((out_dim, Bp), jnp.float32),
        grid=grid,
        in_specs=[
            pl.BlockSpec((in_dim, tb), lambda i: (0, i)),   # x tile (feature-major)
            const_spec((h1, in_dim)),                       # W1  [out, in]
            const_spec((h1, 1)),                            # b1  [out, 1]
            const_spec((h2, h1)),                           # W2
            const_spec((h2, 1)),                            # b2
            const_spec((out_dim, h2)),                      # W3
            const_spec((out_dim, 1)),                       # b3
        ],
        out_specs=pl.BlockSpec((out_dim, tb), lambda i: (0, i)),
        compiler_params=pltpu.CompilerParams(
            dimension_semantics=("parallel",),
        ),
        cost_estimate=pl.CostEstimate(
            flops=flops, transcendentals=0, bytes_accessed=bytes_accessed),
    )(xt, w1, b1, w2, b2, w3, b3)

    # Padded batch columns are garbage (bias-only rows) and are sliced off here.
    return out[:, :B].T


def init_params(key, input_size=2, output_size=2, h_dim=(32, 32)):
    """Deterministic init matching the PyTorch module's layer shapes.
    Weights kept in native PyTorch Linear layout [out_features, in_features];
    biases stored as [out_features, 1] (2D for TPU, lane-broadcast in-kernel)."""
    hs = [input_size] + list(h_dim) + [output_size]
    params = {}
    for idx, (h0, h1) in enumerate(zip(hs, hs[1:]), start=1):
        key, kw, kb = jax.random.split(key, 3)
        bound = 1.0 / float(jnp.sqrt(h0))
        params[f"w{idx}"] = jax.random.uniform(kw, (h1, h0), jnp.float32, -bound, bound)
        params[f"b{idx}"] = jax.random.uniform(kb, (h1,), jnp.float32, -bound, bound).reshape(h1, 1)
    return params


def reference_forward(x, params):
    h = jnp.maximum(x @ params["w1"].T + params["b1"].T, 0.0)
    h = jnp.maximum(h @ params["w2"].T + params["b2"].T, 0.0)
    return h @ params["w3"].T + params["b3"].T


if __name__ == "__main__":
    key = jax.random.PRNGKey(0)
    key, kx = jax.random.split(key)

    B, input_size, output_size = 64, 2, 2
    params = init_params(key, input_size=input_size, output_size=output_size, h_dim=(32, 32))
    x = jax.random.normal(kx, (B, input_size), jnp.float32)

    out = simple_mlp_forward(x, params)
    out = jax.block_until_ready(out)

    ref = reference_forward(x, params)
    assert out.shape == (B, output_size)
    assert jnp.allclose(out, ref, atol=1e-5, rtol=1e-5), "mismatch vs. reference"

    print("KERNEL_OK")
</pallas_src>

<mosaic_0001>
module attributes {stable_mosaic.version = 11 : i64} {
  func.func @mlp_kernel(%arg0: i32, %arg1: memref<2x128xf32, #tpu.memory_space<vmem>>, %arg2: memref<32x2xf32, #tpu.memory_space<vmem>>, %arg3: memref<32x1xf32, #tpu.memory_space<vmem>>, %arg4: memref<32x32xf32, #tpu.memory_space<vmem>>, %arg5: memref<32x1xf32, #tpu.memory_space<vmem>>, %arg6: memref<2x32xf32, #tpu.memory_space<vmem>>, %arg7: memref<2x1xf32, #tpu.memory_space<vmem>>, %arg8: memref<2x128xf32, #tpu.memory_space<vmem>>) attributes {dimension_semantics = [#tpu.dimension_semantics<parallel>], iteration_bounds = array<i64: 1>, scalar_prefetch = 0 : i64, scratch_operands = 0 : i64, tpu.core_type = #tpu.core_type<tc>, window_params = [{transform_indices = @transform_0, window_bounds = array<i64: 2, 128>}, {pipeline_mode = #tpu.pipeline_mode<synchronous>, transform_indices = @transform_1, window_bounds = array<i64: 32, 2>}, {pipeline_mode = #tpu.pipeline_mode<synchronous>, transform_indices = @transform_2, window_bounds = array<i64: 32, 1>}, {pipeline_mode = #tpu.pipeline_mode<synchronous>, transform_indices = @transform_3, window_bounds = array<i64: 32, 32>}, {pipeline_mode = #tpu.pipeline_mode<synchronous>, transform_indices = @transform_4, window_bounds = array<i64: 32, 1>}, {pipeline_mode = #tpu.pipeline_mode<synchronous>, transform_indices = @transform_5, window_bounds = array<i64: 2, 32>}, {pipeline_mode = #tpu.pipeline_mode<synchronous>, transform_indices = @transform_6, window_bounds = array<i64: 2, 1>}, {transform_indices = @transform_7, window_bounds = array<i64: 2, 128>}]} {
    %c0 = arith.constant 0 : index
    %c0_0 = arith.constant 0 : index
    %0 = vector.load %arg1[%c0, %c0_0] : memref<2x128xf32, #tpu.memory_space<vmem>>, vector<2x128xf32>
    %c0_1 = arith.constant 0 : index
    %c0_2 = arith.constant 0 : index
    %1 = vector.load %arg2[%c0_1, %c0_2] : memref<32x2xf32, #tpu.memory_space<vmem>>, vector<32x2xf32>
    %2 = vector.extract_strided_slice %1 {offsets = [0, 0], sizes = [32, 1], strides = [1, 1]} : vector<32x2xf32> to vector<32x1xf32>
    %3 = vector.extract_strided_slice %0 {offsets = [0, 0], sizes = [1, 128], strides = [1, 1]} : vector<2x128xf32> to vector<1x128xf32>
    %4 = vector.broadcast %2 : vector<32x1xf32> to vector<32x128xf32>
    %5 = vector.broadcast %3 : vector<1x128xf32> to vector<32x128xf32>
    %6 = arith.mulf %4, %5 : vector<32x128xf32>
    %7 = vector.extract_strided_slice %1 {offsets = [0, 1], sizes = [32, 1], strides = [1, 1]} : vector<32x2xf32> to vector<32x1xf32>
    %8 = vector.extract_strided_slice %0 {offsets = [1, 0], sizes = [1, 128], strides = [1, 1]} : vector<2x128xf32> to vector<1x128xf32>
    %9 = vector.broadcast %7 : vector<32x1xf32> to vector<32x128xf32>
    %10 = vector.broadcast %8 : vector<1x128xf32> to vector<32x128xf32>
    %11 = arith.mulf %9, %10 : vector<32x128xf32>
    %12 = arith.addf %6, %11 : vector<32x128xf32>
    %c0_3 = arith.constant 0 : index
    %c0_4 = arith.constant 0 : index
    %13 = vector.load %arg3[%c0_3, %c0_4] : memref<32x1xf32, #tpu.memory_space<vmem>>, vector<32x1xf32>
    %14 = vector.broadcast %13 : vector<32x1xf32> to vector<32x128xf32>
    %15 = arith.addf %12, %14 : vector<32x128xf32>
    %cst = arith.constant 0.000000e+00 : f32
    %16 = vector.broadcast %cst : f32 to vector<32x128xf32>
    %17 = arith.maximumf %15, %16 : vector<32x128xf32>
    %c0_5 = arith.constant 0 : index
    %c0_6 = arith.constant 0 : index
    %18 = vector.load %arg4[%c0_5, %c0_6] : memref<32x32xf32, #tpu.memory_space<vmem>>, vector<32x32xf32>
    %cst_7 = arith.constant dense<0.000000e+00> : vector<32x128xf32>
    %19 = tpu.matmul %18, %17, %cst_7 {dimension_numbers = #tpu.dot_dimension_numbers<[1], [0], [0], [1], [0, 0, 1, 1], [], []>} : vector<32x32xf32>, vector<32x128xf32>, vector<32x128xf32> -> vector<32x128xf32>
    %c0_8 = arith.constant 0 : index
    %c0_9 = arith.constant 0 : index
    %20 = vector.load %arg5[%c0_8, %c0_9] : memref<32x1xf32, #tpu.memory_space<vmem>>, vector<32x1xf32>
    %21 = vector.broadcast %20 : vector<32x1xf32> to vector<32x128xf32>
    %22 = arith.addf %19, %21 : vector<32x128xf32>
    %cst_10 = arith.constant 0.000000e+00 : f32
    %23 = vector.broadcast %cst_10 : f32 to vector<32x128xf32>
    %24 = arith.maximumf %22, %23 : vector<32x128xf32>
    %c0_11 = arith.constant 0 : index
    %c0_12 = arith.constant 0 : index
    %25 = vector.load %arg6[%c0_11, %c0_12] : memref<2x32xf32, #tpu.memory_space<vmem>>, vector<2x32xf32>
    %cst_13 = arith.constant dense<0.000000e+00> : vector<2x128xf32>
    %26 = tpu.matmul %25, %24, %cst_13 {dimension_numbers = #tpu.dot_dimension_numbers<[1], [0], [0], [1], [0, 0, 1, 1], [], []>} : vector<2x32xf32>, vector<32x128xf32>, vector<2x128xf32> -> vector<2x128xf32>
    %c0_14 = arith.constant 0 : index
    %c0_15 = arith.constant 0 : index
    %27 = vector.load %arg7[%c0_14, %c0_15] : memref<2x1xf32, #tpu.memory_space<vmem>>, vector<2x1xf32>
    %28 = vector.broadcast %27 : vector<2x1xf32> to vector<2x128xf32>
    %29 = arith.addf %26, %28 : vector<2x128xf32>
    %c0_16 = arith.constant 0 : index
    %c0_17 = arith.constant 0 : index
    %30 = vector.load %arg8[%c0_16, %c0_17] : memref<2x128xf32, #tpu.memory_space<vmem>>, vector<2x128xf32>
    tpu.vector_store %arg8[%c0_16, %c0_17], %29 {strides = array<i32>} : memref<2x128xf32, #tpu.memory_space<vmem>>, vector<2x128xf32>,
    return
  }
  func.func @transform_0(%arg0: i32) -> (i32, i32) {
    %c0_i32 = arith.constant 0 : i32
    %c0_i32_0 = arith.constant 0 : i32
    return %c0_i32, %arg0 : i32, i32
  }
  func.func @transform_1(%arg0: i32) -> (i32, i32) {
    %c0_i32 = arith.constant 0 : i32
    %c0_i32_0 = arith.constant 0 : i32
    %c0_i32_1 = arith.constant 0 : i32
    return %c0_i32, %c0_i32_0 : i32, i32
  }
  func.func @transform_2(%arg0: i32) -> (i32, i32) {
    %c0_i32 = arith.constant 0 : i32
    %c0_i32_0 = arith.constant 0 : i32
    %c0_i32_1 = arith.constant 0 : i32
    return %c0_i32, %c0_i32_0 : i32, i32
  }
  func.func @transform_3(%arg0: i32) -> (i32, i32) {
    %c0_i32 = arith.constant 0 : i32
    %c0_i32_0 = arith.constant 0 : i32
    %c0_i32_1 = arith.constant 0 : i32
    return %c0_i32, %c0_i32_0 : i32, i32
  }
  func.func @transform_4(%arg0: i32) -> (i32, i32) {
    %c0_i32 = arith.constant 0 : i32
    %c0_i32_0 = arith.constant 0 : i32
    %c0_i32_1 = arith.constant 0 : i32
    return %c0_i32, %c0_i32_0 : i32, i32
  }
  func.func @transform_5(%arg0: i32) -> (i32, i32) {
    %c0_i32 = arith.constant 0 : i32
    %c0_i32_0 = arith.constant 0 : i32
    %c0_i32_1 = arith.constant 0 : i32
    return %c0_i32, %c0_i32_0 : i32, i32
  }
  func.func @transform_6(%arg0: i32) -> (i32, i32) {
    %c0_i32 = arith.constant 0 : i32
    %c0_i32_0 = arith.constant 0 : i32
    %c0_i32_1 = arith.constant 0 : i32
    return %c0_i32, %c0_i32_0 : i32, i32
  }
  func.func @transform_7(%arg0: i32) -> (i32, i32) {
    %c0_i32 = arith.constant 0 : i32
    %c0_i32_0 = arith.constant 0 : i32
    return %c0_i32, %arg0 : i32, i32
  }
}

</mosaic_0001>

<bundles_post_ra>
// kernel: tpu_custom_call.1
= control target key start
LH: loop header
LB: loop body
LE: loop exit
PB: predicated region body
PF: predicated region fallthrough
CT: control target
= control target key end

     0   :  { %v438_v2 = vmov 1   ;;  %s558_s0 = inlined_call_operand.vmem [shape: f32[2,128], index: 0, kind: input, shape index: {}]   ;;  %s559_s1 = inlined_call_operand.vmem [shape: f32[32,2], index: 1, kind: input, shape index: {}]   ;;  %s560_s2 = inlined_call_operand.vmem [shape: f32[32,1], index: 2, kind: input, shape index: {}]   ;;  %s561_s3 = inlined_call_operand.vmem [shape: f32[32,32], index: 3, kind: input, shape index: {}]   ;;  %s562_s4 = inlined_call_operand.vmem [shape: f32[32,1], index: 4, kind: input, shape index: {}]   ;;  %s563_s5 = inlined_call_operand.vmem [shape: f32[2,32], index: 5, kind: input, shape index: {}]   ;;  %s564_s6 = inlined_call_operand.vmem [shape: f32[2,1], index: 6, kind: input, shape index: {}]   ;;  %s565_s7 = inlined_call_operand.hbm [shape: f32[2,128], index: 7, kind: output, shape index: {}]  }
   0x1   :  { %v30_v0 = vld [vmem:[%s559_s1 + $0x10] sm:$0xff]  ;;  %v28_v1 = vld [vmem:[%s559_s1] sm:$0xff]  ;;  %410 = vset.pattern.permute.xlu0 %v438_v2  ;;  %408 = vset.pattern.permute.xlu1 %v438_v2  ;;  %v29_v3 = vld [vmem:[%s559_s1 + $0x8] sm:$0xff] }
   0x2   :  { %69 = vperm.xlu0 %410, %v30_v0   ;;  %61 = vperm.xlu1 %408, %v28_v1  }
   0x3   :  { %12 = vsyncpa [#allocation3], 0  ;;  %v439_v4 = vmov 0   ;;  %v31_v5 = vld [vmem:[%s559_s1 + $0x18] sm:$0xff]  ;;  %v89_v6 = vld [vmem:[%s560_s2 + $0x8] sm:$0xff]  ;;  %vm148_vm0 = vcmask 261120   ;;  %v52_v16 = vlaneseq }
   0x4   :  { %v88_v7 = vld [vmem:[%s560_s2] sm:$0xff]  ;;  %v90_v9 = vld [vmem:[%s560_s2 + $0x10] sm:$0xff]  ;;  %v91_v11 = vld [vmem:[%s560_s2 + $0x18] sm:$0xff]  ;;  %v440_v60 = vmov 0.0|0.0   ;;  %vm441_vm1 = vmmov 0   ;;  %v442_v61 = vmov 0.0  }
   0x5   :  { %v124_v8 = vld [vmem:[%s562_s4] sm:$0xff]  ;;  %v126_v10 = vld [vmem:[%s562_s4 + $0x10] sm:$0xff]  ;;  %v125_v13 = vld [vmem:[%s562_s4 + $0x8] sm:$0xff]  ;;  %v53_v19 = vshrl.u32 %v52_v16, 7  ;;  %396 = vmatprep.subr.bf16.mxu1 %v440_v60  ;;  %385 = vmatprep.mubr.msk.f32.mxu1 %vm441_vm1, %v442_v61  ;;  %s443_s10 = smov [#allocation2]  }
   0x6   :  { %411 = vset.pattern.permute.xlu0 %v439_v4  ;;  %65 = vperm.xlu1 %408, %v29_v3   ;;  %v251_v12 = vld [vmem:[%s564_s6] sm:$0x3]  ;;  %v127_v14 = vld [vmem:[%s562_s4 + $0x18] sm:$0xff]  ;;  %v121_v57 = vld [vmem:[%s561_s3 + $0x8] sm:$0xff]  ;;  %s337_s11 = sshll.u32 %s443_s10, 4  ;;  %s338_s11 = int_to_ptr.vmem [resolvable:$true] %s337_s11 }
   0x7   :  { %34 = vperm.xlu0 %411, %v28_v1   ;;  %v120_v15 = vld [vmem:[%s561_s3] sm:$0xff]  ;;  %v54_v22 = vsub.s32 0, %v53_v19  ;;  %v78_v23 = vsub.s32 1, %v53_v19  ;;  %v122_v58 = vld [vmem:[%s561_s3 + $0x10] sm:$0xff]  ;;  %v123_v59 = vld [vmem:[%s561_s3 + $0x18] sm:$0xff]  ;;  %s414_s12 = scalar_lea.vmem %s338_s11, 32  ;;  %p419_p1 = scmp.lt.s32.totalorder %s338_s11, %s338_s11 }
   0x8   :  { %371 = vmatprep.mubr.msk.f32.mxu0 %vm148_vm0, %v120_v15  ;;  %v27_v24 = vld [vmem:[%s558_s0] sm:$0x3]  ;;  %p415_p0 = scmp.ne.s32.totalorder %s338_s11, %s414_s12  ;;  %p420_p2 = scmp.lt.s32.totalorder %s414_s12, %s414_s12 }
   0x9   :  { %v55_v27 = vrot.slane %v27_v24, %v54_v22  ;;  %v79_v28 = vrot.slane %v27_v24, %v78_v23  ;;  %v250_v16 = vld [vmem:[%s563_s5] sm:$0x3] }
   0xa   :  { %409 = vset.pattern.permute.xlu1 %v439_v4  ;;  %p421_p3 = por %p420_p2, %p419_p1 }
   0xb   :  { %39 = vperm.xlu0 %411, %v29_v3   ;;  %49 = vperm.xlu1 %409, %v31_v5  }
   0xc   :  { %p422_p4 = pnand %p421_p3, %p415_p0 }
   0xf   :  { %44 = vperm.xlu0 %411, %v30_v0   ;;  %412 = vset.pattern.permute.xlu1 %v438_v2 }
  0x10   :  { %73 = vperm.xlu1 %412, %v31_v5  }
  0x13   :  { %99 = vperm.xlu0 %411, %v89_v6  }
  0x14   :  { %413 = vset.pattern.permute.xlu1 %v439_v4 }
  0x15   :  { %94 = vperm.xlu1 %413, %v88_v7  }
  0x17   :  { %130 = vperm.xlu0 %411, %v124_v8  }
  0x19   :  { %104 = vperm.xlu1 %413, %v90_v9  }
  0x1b   :  { %140 = vperm.xlu0 %411, %v126_v10  }
  0x1d   :  { %109 = vperm.xlu1 %413, %v91_v11  }
  0x1f   :  { %254 = vperm.xlu0 %411, %v251_v12  }
  0x21   :  { %135 = vperm.xlu1 %413, %v125_v13  }
  0x25   :  { %145 = vperm.xlu1 %413, %v127_v14  }
  0x81   :  { %v62_v17 = vpop.permute.xlu1 %61  ;;  %v70_v18 = vpop.permute.xlu0 %69 }
  0x82   :  { %v80_v34 = vmul.f32 %v79_v28, %v62_v17  ;;  %v82_v42 = vmul.f32 %v79_v28, %v70_v18 }
  0x85   :  { %v66_v20 = vpop.permute.xlu1 %65 }
  0x86   :  { %v35_v21 = vpop.permute.xlu0 %34  ;;  %v81_v31 = vmul.f32 %v79_v28, %v66_v20 }
  0x87   :  { %v56_v32 = vmul.f32 %v55_v27, %v35_v21 }
  0x89   :  { %v84_v38 = vadd.f32 %v80_v34, %v56_v32 }
  0x8a   :  { %v40_v25 = vpop.permute.xlu0 %39  ;;  %v50_v26 = vpop.permute.xlu1 %49 }
  0x8b   :  { %v57_v29 = vmul.f32 %v55_v27, %v40_v25  ;;  %v59_v47 = vmul.f32 %v55_v27, %v50_v26 }
  0x8d   :  { %v85_v35 = vadd.f32 %v81_v31, %v57_v29 }
  0x8e   :  { %v45_v30 = vpop.permute.xlu0 %44 }
  0x8f   :  { %v74_v33 = vpop.permute.xlu1 %73  ;;  %v58_v40 = vmul.f32 %v55_v27, %v45_v30 }
  0x90   :  { %v83_v43 = vmul.f32 %v79_v28, %v74_v33 }
  0x91   :  { %v86_v48 = vadd.f32 %v82_v42, %v58_v40 }
  0x92   :  { %v100_v36 = vpop.permute.xlu0 %99  ;;  %v87_v51 = vadd.f32 %v83_v43, %v59_v47 }
  0x93   :  { %v113_v37 = vadd.f32 %v100_v36, %v85_v35 }
  0x94   :  { %v95_v39 = vpop.permute.xlu1 %94 }
  0x95   :  { %v112_v41 = vadd.f32 %v95_v39, %v84_v38  ;;  %v117_v44 = vmax.f32 %v113_v37, 0.0 }
  0x96   :  { %v131_v63 = vpop.permute.xlu0 %130 }
  0x97   :  { %v116_v45 = vmax.f32 %v112_v41, 0.0 }
  0x98   :  { %v105_v46 = vpop.permute.xlu1 %104 }
  0x99   :  { %v388_v49 = vpack.c.bf16 %v117_v44, %v116_v45  ;;  %v114_v50 = vadd.f32 %v105_v46, %v86_v48 }
  0x9a   :  { %v141_v8 = vpop.permute.xlu0 %140 }
  0x9b   :  { %389 = vmatprep.subr.bf16.mxu0 %v388_v49  ;;  %v118_v54 = vmax.f32 %v114_v50, 0.0 }
  0x9c   :  { %v110_v52 = vpop.permute.xlu1 %109  ;;  %391 = vmatpush3.bf16.msra.mxu0 %v388_v49 }
  0x9d   :  { %v115_v53 = vadd.f32 %v110_v52, %v87_v51 }
  0x9e   :  { %v255_v17 = vpop.permute.xlu0 %254 }
  0x9f   :  { %v119_v55 = vmax.f32 %v115_v53, 0.0 }
  0xa0   :  { %v136_v62 = vpop.permute.xlu1 %135 }
  0xa1   :  { %v392_v56 = vpack.c.bf16 %v119_v55, %v118_v54 }
  0xa3   :  { %393 = vmatprep.subr.bf16.mxu0 %v392_v56 }
  0xa4   :  { %395 = vmatpush3.bf16.msra.mxu0 %v392_v56  ;;  %v146_v5 = vpop.permute.xlu1 %145 }
  0xa7   :  { %372 = vmatmul.mubr.msk.f32.vlgmr.msra.gmra.mrb[0].mxu0 %vm148_vm0, %v121_v57 }
  0xa8   :  { %374 = vmatprep.mubr.msk.f32.mxu0 %vm148_vm0, %v122_v58 }
  0xab   :  { %375 = vmatmul.mubr.msk.f32.gmra.mrb[2].mxu0 %vm148_vm0, %v123_v59 }
 0x17a   :  { %v373_v0 = vpop.f32.mrb[0].mxu0 }
 0x17b   :  { %v233_v1 = vadd.f32 %v373_v0, %v136_v62  ;;  %v227_v2 = vpop.f32.mrb[1].mxu0 }
 0x17c   :  { %v228_v3 = vadd.f32 %v227_v2, %v131_v63 }
 0x17d   :  { %v247_v4 = vmax.f32 %v233_v1, 0.0 }
 0x17e   :  { %v246_v6 = vmax.f32 %v228_v3, 0.0  ;;  %v376_v7 = vpop.f32.mrb[2].mxu0 }
 0x17f   :  { %v243_v9 = vadd.f32 %v376_v7, %v146_v5  ;;  %v237_v10 = vpop.f32.mrb[3].mxu0 }
 0x180   :  { %v238_v11 = vadd.f32 %v237_v10, %v141_v8  ;;  %v397_v12 = vpack.c.bf16 %v247_v4, %v246_v6 }
 0x181   :  { %v249_v13 = vmax.f32 %v243_v9, 0.0 }
 0x182   :  { %v248_v14 = vmax.f32 %v238_v11, 0.0  ;;  %398 = vmatpush3.bf16.msra.mxu1 %v397_v12 }
 0x183   :  { %399 = vmatprep.subr.bf16.mxu1 %v440_v60 }
 0x184   :  { %v400_v15 = vpack.c.bf16 %v249_v13, %v248_v14 }
 0x186   :  { %401 = vmatpush3.bf16.msra.mxu1 %v400_v15 }
 0x189   :  { %386 = vmatmul.mubr.msk.f32.vlgmr.msra.gmra.mrb[0].mxu1 %vm148_vm0, %v250_v16 }
 0x25c   :  { %v326_v18 = vpop.f32.mrb[0].mxu1 }
 0x25d   :  { %v327_v19 = vadd.f32 %v326_v18, %v255_v17  ;;  %v387_v20 = vpop.f32.mrb[1].mxu1 }
 0x25f   :  { %330 = vst [vmem:[#allocation2] sm:$0x3] %v327_v19 }
 0x260   :  { %425 = shalt.err (!%p422_p4)
}
 0x261   :  { %s426_s5 = scalar_lea.hbm %s565_s7, 32 }
 0x262   :  { %p427_p5 = scmp.ne.s32.totalorder %s565_s7, %s426_s5  ;;  %p430_p6 = scmp.lt.u32.totalorder %s426_s5, %s565_s7 }
 0x264   :  { %p432_p7 = pnand %p430_p6, %p427_p5 }
 0x266   :  { %435 = shalt.err (!%p432_p7)
}
 0x267   :  { %340 = dma.vmem_to_hbm [thread:$0]  %s338_s11, 32, %s565_s7, [#allocation3]  }
 0x268   :  { %436 = dma.done.wait [#allocation3], 32  }
 0x269   :  { %437 = vsyncadd [#allocation3], 4294967264 }
 0x26a   :  { %344 = vsyncpa [#allocation3], 1 }

</bundles_post_ra>
